<compile_context>
chip_gen: v7x
topology: tpu7x:2x2x1
jax: 0.10.0
libtpu: 0.0.40
codegen_flags: <defaults>
</compile_context>

<pallas_src>
import numpy as np
import jax
import jax.numpy as jnp
from jax.experimental import pallas as pl
from jax.experimental.pallas import tpu as pltpu


def make_positional_encoding(embed_dim: int, max_seq_length: int = 100) -> jnp.ndarray:
    """Reproduces the PyTorch buffer `pe` of shape (1, max_seq_length, embed_dim)."""
    position = jnp.arange(0, max_seq_length, dtype=jnp.float32)[:, None]          # (L, 1)
    div_term = jnp.exp(
        jnp.arange(0, embed_dim, 2, dtype=jnp.float32) * (-np.log(10000.0) / embed_dim)
    )                                                                              # (E/2,)
    angles = position * div_term                                                   # (L, E/2)
    pe = jnp.zeros((max_seq_length, embed_dim), dtype=jnp.float32)
    pe = pe.at[:, 0::2].set(jnp.sin(angles))
    pe = pe.at[:, 1::2].set(jnp.cos(angles))
    return pe[None, :, :]                                                          # (1, L, E)


def _add_pe_kernel(x_ref, pe_ref, o_ref):
    # x_ref, pe_ref, o_ref: (TB, S*E) tiles -> shape-matched VPU add, no
    # in-kernel broadcast, unmasked lane-dense stores.
    o_ref[...] = (x_ref[...] + pe_ref[...]).astype(o_ref.dtype)


def positional_encoding_forward(x: jnp.ndarray, pe: jnp.ndarray) -> jnp.ndarray:
    """x: (B, S, E); pe: (1, L, E) with L >= S.  Returns x + pe[:, :S]."""
    B, S, E = x.shape
    SE = S * E

    # Lane-dense 2D view: last dim is S*E (multiple of 128 for realistic S*E,
    # and always the full array extent, which satisfies the tiling constraint).
    x2 = x.reshape(B, SE)
    pe_flat = pe[0, :S, :].astype(x.dtype).reshape(SE)

    # --- tile-size selection: ~4 MiB of x per grid step -------------------
    itemsize = jnp.dtype(x.dtype).itemsize
    row_bytes = SE * itemsize
    target_bytes = 4 * 1024 * 1024
    max_rows = max(1, target_bytes // row_bytes)
    if B <= max_rows:
        tb = B                              # single full block over the batch
    else:
        tb = max(8, (max_rows // 8) * 8)    # multiple of 8 rows for sublanes
        tb = min(tb, B)
    grid = (pl.cdiv(B, tb),)

    # pe broadcast ONCE in the wrapper to exactly one tile; constant index_map
    # keeps it VMEM-resident across all grid steps (single DMA).
    pe_tile = jnp.broadcast_to(pe_flat[None, :], (tb, SE))

    grid_spec = pltpu.PrefetchScalarGridSpec(
        num_scalar_prefetch=0,
        grid=grid,
        in_specs=[
            pl.BlockSpec((tb, SE), lambda i: (i, 0)),   # x tile
            pl.BlockSpec((tb, SE), lambda i: (0, 0)),   # resident pe tile
        ],
        out_specs=pl.BlockSpec((tb, SE), lambda i: (i, 0)),
    )

    cost = pl.CostEstimate(
        flops=int(B * SE),
        transcendentals=0,
        bytes_accessed=int(2 * B * SE * itemsize + tb * SE * itemsize),
    )

    out2 = pl.pallas_call(
        _add_pe_kernel,
        out_shape=jax.ShapeDtypeStruct((B, SE), x.dtype),
        grid_spec=grid_spec,
        compiler_params=pltpu.CompilerParams(
            dimension_semantics=("parallel",),
            vmem_limit_bytes=48 * 1024 * 1024,
        ),
        cost_estimate=cost,
    )(x2, pe_tile)

    return out2.reshape(B, S, E)


if __name__ == "__main__":
    # Small shapes implied by the module's forward: (batch, seq, embed_dim)
    B, S, E = 2, 8, 32
    MAX_SEQ = 100

    key = jax.random.PRNGKey(0)
    x = jax.random.normal(key, (B, S, E), dtype=jnp.float32)

    pe = make_positional_encoding(E, MAX_SEQ)

    out = positional_encoding_forward(x, pe)
    out = jax.block_until_ready(out)

    # Reference check against plain-JAX semantics of the PyTorch forward
    ref = x + pe[:, :S, :]
    np.testing.assert_allclose(np.asarray(out), np.asarray(ref), rtol=1e-6, atol=1e-6)

    print("KERNEL_OK")
</pallas_src>

<mosaic_0001>
module attributes {stable_mosaic.version = 11 : i64} {
  func.func @_add_pe_kernel(%arg0: i32, %arg1: memref<2x256xf32, #tpu.memory_space<vmem>>, %arg2: memref<2x256xf32, #tpu.memory_space<vmem>>, %arg3: memref<2x256xf32, #tpu.memory_space<vmem>>) attributes {dimension_semantics = [#tpu.dimension_semantics<parallel>], iteration_bounds = array<i64: 1>, scalar_prefetch = 0 : i64, scratch_operands = 0 : i64, tpu.core_type = #tpu.core_type<tc>, window_params = [{transform_indices = @transform_0, window_bounds = array<i64: 2, 256>}, {pipeline_mode = #tpu.pipeline_mode<synchronous>, transform_indices = @transform_1, window_bounds = array<i64: 2, 256>}, {transform_indices = @transform_2, window_bounds = array<i64: 2, 256>}]} {
    %c0 = arith.constant 0 : index
    %c0_0 = arith.constant 0 : index
    %0 = vector.load %arg1[%c0, %c0_0] : memref<2x256xf32, #tpu.memory_space<vmem>>, vector<2x256xf32>
    %c0_1 = arith.constant 0 : index
    %c0_2 = arith.constant 0 : index
    %1 = vector.load %arg2[%c0_1, %c0_2] : memref<2x256xf32, #tpu.memory_space<vmem>>, vector<2x256xf32>
    %2 = arith.addf %0, %1 : vector<2x256xf32>
    %c0_3 = arith.constant 0 : index
    %c0_4 = arith.constant 0 : index
    %3 = vector.load %arg3[%c0_3, %c0_4] : memref<2x256xf32, #tpu.memory_space<vmem>>, vector<2x256xf32>
    tpu.vector_store %arg3[%c0_3, %c0_4], %2 {strides = array<i32>} : memref<2x256xf32, #tpu.memory_space<vmem>>, vector<2x256xf32>,
    return
  }
  func.func @transform_0(%arg0: i32) -> (i32, i32) {
    %c0_i32 = arith.constant 0 : i32
    %c0_i32_0 = arith.constant 0 : i32
    return %arg0, %c0_i32 : i32, i32
  }
  func.func @transform_1(%arg0: i32) -> (i32, i32) {
    %c0_i32 = arith.constant 0 : i32
    %c0_i32_0 = arith.constant 0 : i32
    %c0_i32_1 = arith.constant 0 : i32
    return %c0_i32, %c0_i32_0 : i32, i32
  }
  func.func @transform_2(%arg0: i32) -> (i32, i32) {
    %c0_i32 = arith.constant 0 : i32
    %c0_i32_0 = arith.constant 0 : i32
    return %arg0, %c0_i32 : i32, i32
  }
}

</mosaic_0001>

<bundles_post_ra>
// kernel: tpu_custom_call.1
= control target key start
LH: loop header
LB: loop body
LE: loop exit
PB: predicated region body
PF: predicated region fallthrough
CT: control target
= control target key end

     0   :  { %7 = vsyncpa [#allocation3], 0  ;;  %s185_s0 = inlined_call_operand.hbm [shape: f32[2,256], index: 0, kind: input, shape index: {}]   ;;  %s186_s1 = inlined_call_operand.hbm [shape: f32[2,256], index: 1, kind: input, shape index: {}]   ;;  %s187_s2 = inlined_call_operand.hbm [shape: f32[2,256], index: 2, kind: output, shape index: {}]  }
   0x1   :  { %8 = vsyncpa [#allocation6], 0 }
   0x2   :  { %9 = vsyncpa [#allocation4], 0  ;;  %s131_s9 = smov [#allocation2]   ;;  %s132_s11 = smov [#allocation5]  }
   0x3   :  { %s16_s10 = sshll.u32 %s131_s9, 4  ;;  %s26_s12 = sshll.u32 %s132_s11, 4  ;;  %s17_s10 = int_to_ptr.vmem [resolvable:$true] %s16_s10  ;;  %s27_s12 = int_to_ptr.vmem [resolvable:$true] %s26_s12 }
   0x4   :  { %s59_s15 = scalar_lea.hbm %s185_s0, 64 }
   0x5   :  { %p60_p0 = scmp.ne.s32.totalorder %s185_s0, %s59_s15  ;;  %p63_p1 = scmp.lt.u32.totalorder %s59_s15, %s185_s0 }
   0x7   :  { %p65_p2 = pnand %p63_p1, %p60_p0 }
   0x9   :  { %68 = shalt.err (!%p65_p2)
}
   0xa   :  { %s69_s20 = scalar_lea.vmem %s17_s10, 64  ;;  %p74_p4 = scmp.lt.s32.totalorder %s17_s10, %s17_s10 }
   0xb   :  { %p70_p3 = scmp.ne.s32.totalorder %s17_s10, %s69_s20  ;;  %p75_p5 = scmp.lt.s32.totalorder %s69_s20, %s69_s20 }
   0xd   :  { %p76_p6 = por %p75_p5, %p74_p4 }
   0xf   :  { %p77_p7 = pnand %p76_p6, %p70_p3 }
  0x11   :  { %80 = shalt.err (!%p77_p7)
}
  0x12   :  { %19 = dma.hbm_to_vmem [thread:$0]  %s185_s0, 64, %s17_s10, [#allocation3]  }
  0x13   :  { %s81_s25 = scalar_lea.hbm %s186_s1, 64 }
  0x14   :  { %p82_p8 = scmp.ne.s32.totalorder %s186_s1, %s81_s25  ;;  %p85_p9 = scmp.lt.u32.totalorder %s81_s25, %s186_s1 }
  0x16   :  { %p87_p10 = pnand %p85_p9, %p82_p8 }
  0x18   :  { %90 = shalt.err (!%p87_p10)
}
  0x19   :  { %s91_s30 = scalar_lea.vmem %s27_s12, 64  ;;  %p96_p12 = scmp.lt.s32.totalorder %s27_s12, %s27_s12 }
  0x1a   :  { %p92_p11 = scmp.ne.s32.totalorder %s27_s12, %s91_s30  ;;  %p97_p13 = scmp.lt.s32.totalorder %s91_s30, %s91_s30 }
  0x1c   :  { %p98_p0 = por %p97_p13, %p96_p12 }
  0x1e   :  { %p99_p1 = pnand %p98_p0, %p92_p11 }
  0x20   :  { %102 = shalt.err (!%p99_p1)
}
  0x21   :  { %29 = dma.hbm_to_vmem [thread:$0]  %s186_s1, 64, %s27_s12, [#allocation6]  }
  0x22   :  { %125 = dma.done.wait [#allocation3], 64  }
  0x23   :  { %126 = vsyncadd [#allocation3], 4294967232 }
  0x24   :  { %127 = dma.done.wait [#allocation6], 64  }
  0x25   :  { %128 = vsyncadd [#allocation6], 4294967232  ;;  %s133_s4 = smov [#allocation7]   ;;  %v36_v0 = vld [vmem:[#allocation2] sm:$0xf] }
  0x26   :  { %s46_s5 = sshll.u32 %s133_s4, 4  ;;  %v37_v1 = vld [vmem:[#allocation5] sm:$0xf]  ;;  %s47_s5 = int_to_ptr.vmem [resolvable:$true] %s46_s5 }
  0x27   :  { %v38_v2 = vadd.f32 %v37_v1, %v36_v0  ;;  %s103_s6 = scalar_lea.vmem %s47_s5, 64  ;;  %p108_p3 = scmp.lt.s32.totalorder %s47_s5, %s47_s5 }
  0x28   :  { %p104_p2 = scmp.ne.s32.totalorder %s47_s5, %s103_s6  ;;  %p109_p4 = scmp.lt.s32.totalorder %s103_s6, %s103_s6 }
  0x29   :  { %39 = vst [vmem:[#allocation7] sm:$0xf] %v38_v2 }
  0x2a   :  { %p110_p5 = por %p109_p4, %p108_p3 }
  0x2c   :  { %p111_p6 = pnand %p110_p5, %p104_p2 }
  0x2e   :  { %114 = shalt.err (!%p111_p6)
}
  0x2f   :  { %s115_s8 = scalar_lea.hbm %s187_s2, 64 }
  0x30   :  { %p116_p7 = scmp.ne.s32.totalorder %s187_s2, %s115_s8  ;;  %p119_p8 = scmp.lt.u32.totalorder %s115_s8, %s187_s2 }
  0x32   :  { %p121_p9 = pnand %p119_p8, %p116_p7 }
  0x34   :  { %124 = shalt.err (!%p121_p9)
}
  0x35   :  { %49 = dma.vmem_to_hbm [thread:$0]  %s47_s5, 64, %s187_s2, [#allocation4]  }
  0x36   :  { %129 = dma.done.wait [#allocation4], 64  }
  0x37   :  { %130 = vsyncadd [#allocation4], 4294967232 }
  0x38   :  { %53 = vsyncpa [#allocation3], 1 }
  0x39   :  { %54 = vsyncpa [#allocation6], 1 }
  0x3a   :  { %55 = vsyncpa [#allocation4], 1 }

</bundles_post_ra>
